<compile_context>
chip_gen: v7x
topology: tpu7x:2x2x1
jax: 0.10.0
libtpu: 0.0.40
codegen_flags: <defaults>
</compile_context>

<pallas_src>
import jax
import jax.numpy as jnp
from jax.experimental import pallas as pl
from jax.experimental.pallas import tpu as pltpu


_MAX_TILE_ROWS = 128  # (8, 128, 128) f32 block = 2 MiB / grid step = 16384 boxes


def _round_up(x, m):
    return ((x + m - 1) // m) * m


def _iou_loss_kernel(boxes_ref, out_ref):
    # boxes_ref: (8, tile_rows, 128) f32 — sublane-row c = coordinate c, boxes on lanes.
    px1, py1, px2, py2 = boxes_ref[0], boxes_ref[1], boxes_ref[2], boxes_ref[3]
    gx1, gy1, gx2, gy2 = boxes_ref[4], boxes_ref[5], boxes_ref[6], boxes_ref[7]

    # Intersection (clamp at 0, matching torch.clamp(min=0)).
    dx = jnp.maximum(jnp.minimum(px2, gx2) - jnp.maximum(px1, gx1), 0.0)
    dy = jnp.maximum(jnp.minimum(py2, gy2) - jnp.maximum(py1, gy1), 0.0)
    inter = dx * dy  # (tile_rows, 128)

    # Union (forward() never uses self.eps, so neither do we — exact semantics).
    area_p = (px2 - px1) * (py2 - py1)
    area_g = (gx2 - gx1) * (gy2 - gy1)
    union = area_p + area_g - inter

    per_box = 1.0 - inter / union  # (tile_rows, 128); padded cols give exactly 0

    # Vreg-granular partial sum: (tr,128) -> (tr//8, 8, 128) and add along the
    # vreg axis (pure VALU adds, no cross-lane XLU work). Final cross-lane
    # reduction + divide happen once, outside the kernel.
    tr = per_box.shape[0]
    out_ref[...] = jnp.sum(per_box.reshape(tr // 8, 8, 128), axis=0)  # (8, 128)


@jax.jit
def iou_loss_pallas(pred_bbx, gt_bbx):
    """pred_bbx, gt_bbx: [B, 4] (x1, y1, x2, y2) boxes. Returns scalar IoU loss."""
    B = gt_bbx.shape[0]

    rows = (B + 127) // 128                           # 128 boxes per lane-row
    tile_rows = min(_MAX_TILE_ROWS, _round_up(rows, 8))
    padded_rows = _round_up(rows, tile_rows)
    padded_b = padded_rows * 128
    num_tiles = padded_rows // tile_rows

    # Lane-dense repack (transpose + concat + pad fuse into one pass under jit).
    boxes = jnp.concatenate(
        [pred_bbx.astype(jnp.float32).T, gt_bbx.astype(jnp.float32).T], axis=0
    )  # (8, B)
    if padded_b != B:
        # Identical unit boxes (0,0,1,1): inter = union = 1 -> contribution 0.
        pad_col = jnp.array([0.0, 0.0, 1.0, 1.0, 0.0, 0.0, 1.0, 1.0], jnp.float32)
        pad = jnp.broadcast_to(pad_col[:, None], (8, padded_b - B))
        boxes = jnp.concatenate([boxes, pad], axis=1)
    boxes = boxes.reshape(8, padded_rows, 128)        # free row-major reshape

    partials = pl.pallas_call(
        _iou_loss_kernel,
        out_shape=jax.ShapeDtypeStruct((num_tiles, 8, 128), jnp.float32),
        grid_spec=pltpu.PrefetchScalarGridSpec(
            num_scalar_prefetch=0,
            grid=(num_tiles,),
            in_specs=[pl.BlockSpec((8, tile_rows, 128), lambda i: (0, i, 0))],
            out_specs=pl.BlockSpec((None, 8, 128), lambda i: (i, 0, 0)),
        ),
        compiler_params=pltpu.CompilerParams(
            dimension_semantics=("parallel",),
        ),
    )(boxes)

    # Tiny final tree reduction (num_tiles * 1024 f32) + divide by B.
    return jnp.sum(partials) / jnp.float32(B)


def _iou_loss_ref(pred_bbx, gt_bbx):
    """Pure-JAX reference matching the PyTorch forward()."""
    B = gt_bbx.shape[0]
    lower_right = jnp.minimum(pred_bbx[:, 2:], gt_bbx[:, 2:])
    upper_left = jnp.maximum(pred_bbx[:, :2], gt_bbx[:, :2])
    delta = jnp.maximum(lower_right - upper_left, 0.0)  # clamp(min=0)
    inter = delta[:, 0] * delta[:, 1]
    area_p = (pred_bbx[:, 2] - pred_bbx[:, 0]) * (pred_bbx[:, 3] - pred_bbx[:, 1])
    area_g = (gt_bbx[:, 2] - gt_bbx[:, 0]) * (gt_bbx[:, 3] - gt_bbx[:, 1])
    union = area_p + area_g - inter
    return jnp.sum(1.0 - inter / union) / B


if __name__ == "__main__":
    key = jax.random.PRNGKey(0)

    def make_boxes(k, B):
        # Well-formed boxes: (x1, y1) uniform, (x2, y2) = (x1, y1) + positive extent.
        k1, k2 = jax.random.split(k)
        ul = jax.random.uniform(k1, (B, 2), jnp.float32, 0.0, 8.0)
        wh = jax.random.uniform(k2, (B, 2), jnp.float32, 1.0, 8.0)
        return jnp.concatenate([ul, ul + wh], axis=1)  # (B, 4)

    # B=8:     the module's natural tiny case (single (8,8,128) padded tile).
    # B=2051:  non-multiple-of-128 tail padding, still one grid step.
    # B=20000: exercises the multi-step "parallel" grid and partial-sum outputs.
    for B in (8, 2051, 20000):
        kp, kg, key = jax.random.split(key, 3)
        pred_bbx = make_boxes(kp, B)
        gt_bbx = make_boxes(kg, B)

        loss = jax.block_until_ready(iou_loss_pallas(pred_bbx, gt_bbx))
        ref = _iou_loss_ref(pred_bbx, gt_bbx)
        assert jnp.allclose(loss, ref, rtol=1e-5, atol=1e-5), (B, loss, ref)

    print("KERNEL_OK")
</pallas_src>

<mosaic_0001>
module attributes {stable_mosaic.version = 11 : i64} {
  func.func @_iou_loss_kernel(%arg0: i32, %arg1: memref<8x8x128xf32, #tpu.memory_space<vmem>>, %arg2: memref<1x8x128xf32, #tpu.memory_space<vmem>>) attributes {dimension_semantics = [#tpu.dimension_semantics<parallel>], iteration_bounds = array<i64: 1>, scalar_prefetch = 0 : i64, scratch_operands = 0 : i64, tpu.core_type = #tpu.core_type<tc>, window_params = [{transform_indices = @transform_0, window_bounds = array<i64: 8, 8, 128>}, {transform_indices = @transform_1, window_bounds = array<i64: 1, 8, 128>}]} {
    %c0 = arith.constant 0 : index
    %c0_0 = arith.constant 0 : index
    %c0_1 = arith.constant 0 : index
    %0 = vector.load %arg1[%c0, %c0_0, %c0_1] : memref<8x8x128xf32, #tpu.memory_space<vmem>>, vector<1x8x128xf32>
    %1 = vector.shape_cast %0 : vector<1x8x128xf32> to vector<8x128xf32>
    %c1 = arith.constant 1 : index
    %c0_2 = arith.constant 0 : index
    %c0_3 = arith.constant 0 : index
    %2 = vector.load %arg1[%c1, %c0_2, %c0_3] : memref<8x8x128xf32, #tpu.memory_space<vmem>>, vector<1x8x128xf32>
    %3 = vector.shape_cast %2 : vector<1x8x128xf32> to vector<8x128xf32>
    %c2 = arith.constant 2 : index
    %c0_4 = arith.constant 0 : index
    %c0_5 = arith.constant 0 : index
    %4 = vector.load %arg1[%c2, %c0_4, %c0_5] : memref<8x8x128xf32, #tpu.memory_space<vmem>>, vector<1x8x128xf32>
    %5 = vector.shape_cast %4 : vector<1x8x128xf32> to vector<8x128xf32>
    %c3 = arith.constant 3 : index
    %c0_6 = arith.constant 0 : index
    %c0_7 = arith.constant 0 : index
    %6 = vector.load %arg1[%c3, %c0_6, %c0_7] : memref<8x8x128xf32, #tpu.memory_space<vmem>>, vector<1x8x128xf32>
    %7 = vector.shape_cast %6 : vector<1x8x128xf32> to vector<8x128xf32>
    %c4 = arith.constant 4 : index
    %c0_8 = arith.constant 0 : index
    %c0_9 = arith.constant 0 : index
    %8 = vector.load %arg1[%c4, %c0_8, %c0_9] : memref<8x8x128xf32, #tpu.memory_space<vmem>>, vector<1x8x128xf32>
    %9 = vector.shape_cast %8 : vector<1x8x128xf32> to vector<8x128xf32>
    %c5 = arith.constant 5 : index
    %c0_10 = arith.constant 0 : index
    %c0_11 = arith.constant 0 : index
    %10 = vector.load %arg1[%c5, %c0_10, %c0_11] : memref<8x8x128xf32, #tpu.memory_space<vmem>>, vector<1x8x128xf32>
    %11 = vector.shape_cast %10 : vector<1x8x128xf32> to vector<8x128xf32>
    %c6 = arith.constant 6 : index
    %c0_12 = arith.constant 0 : index
    %c0_13 = arith.constant 0 : index
    %12 = vector.load %arg1[%c6, %c0_12, %c0_13] : memref<8x8x128xf32, #tpu.memory_space<vmem>>, vector<1x8x128xf32>
    %13 = vector.shape_cast %12 : vector<1x8x128xf32> to vector<8x128xf32>
    %c7 = arith.constant 7 : index
    %c0_14 = arith.constant 0 : index
    %c0_15 = arith.constant 0 : index
    %14 = vector.load %arg1[%c7, %c0_14, %c0_15] : memref<8x8x128xf32, #tpu.memory_space<vmem>>, vector<1x8x128xf32>
    %15 = vector.shape_cast %14 : vector<1x8x128xf32> to vector<8x128xf32>
    %16 = arith.minimumf %5, %13 : vector<8x128xf32>
    %17 = arith.maximumf %1, %9 : vector<8x128xf32>
    %18 = arith.subf %16, %17 : vector<8x128xf32>
    %cst = arith.constant 0.000000e+00 : f32
    %19 = vector.broadcast %cst : f32 to vector<8x128xf32>
    %20 = arith.maximumf %18, %19 : vector<8x128xf32>
    %21 = arith.minimumf %7, %15 : vector<8x128xf32>
    %22 = arith.maximumf %3, %11 : vector<8x128xf32>
    %23 = arith.subf %21, %22 : vector<8x128xf32>
    %cst_16 = arith.constant 0.000000e+00 : f32
    %24 = vector.broadcast %cst_16 : f32 to vector<8x128xf32>
    %25 = arith.maximumf %23, %24 : vector<8x128xf32>
    %26 = arith.mulf %20, %25 : vector<8x128xf32>
    %27 = arith.subf %5, %1 : vector<8x128xf32>
    %28 = arith.subf %7, %3 : vector<8x128xf32>
    %29 = arith.mulf %27, %28 : vector<8x128xf32>
    %30 = arith.subf %13, %9 : vector<8x128xf32>
    %31 = arith.subf %15, %11 : vector<8x128xf32>
    %32 = arith.mulf %30, %31 : vector<8x128xf32>
    %33 = arith.addf %29, %32 : vector<8x128xf32>
    %34 = arith.subf %33, %26 : vector<8x128xf32>
    %35 = arith.divf %26, %34 : vector<8x128xf32>
    %cst_17 = arith.constant 1.000000e+00 : f32
    %36 = vector.broadcast %cst_17 : f32 to vector<8x128xf32>
    %37 = arith.subf %36, %35 : vector<8x128xf32>
    %38 = vector.shape_cast %37 : vector<8x128xf32> to vector<1x8x128xf32>
    %cst_18 = arith.constant dense<0.000000e+00> : vector<8x128xf32>
    %39 = vector.multi_reduction <add>, %38, %cst_18 [0] : vector<1x8x128xf32> to vector<8x128xf32>
    %c0_19 = arith.constant 0 : index
    %c0_20 = arith.constant 0 : index
    %c0_21 = arith.constant 0 : index
    %40 = vector.load %arg2[%c0_19, %c0_20, %c0_21] : memref<1x8x128xf32, #tpu.memory_space<vmem>>, vector<1x8x128xf32>
    %41 = vector.shape_cast %40 : vector<1x8x128xf32> to vector<8x128xf32>
    %42 = vector.shape_cast %39 : vector<8x128xf32> to vector<1x8x128xf32>
    tpu.vector_store %arg2[%c0_19, %c0_20, %c0_21], %42 {strides = array<i32>} : memref<1x8x128xf32, #tpu.memory_space<vmem>>, vector<1x8x128xf32>,
    return
  }
  func.func @transform_0(%arg0: i32) -> (i32, i32, i32) {
    %c0_i32 = arith.constant 0 : i32
    %c0_i32_0 = arith.constant 0 : i32
    %c0_i32_1 = arith.constant 0 : i32
    return %c0_i32, %arg0, %c0_i32_0 : i32, i32, i32
  }
  func.func @transform_1(%arg0: i32) -> (i32, i32, i32) {
    %c0_i32 = arith.constant 0 : i32
    %c0_i32_0 = arith.constant 0 : i32
    %c0_i32_1 = arith.constant 0 : i32
    return %arg0, %c0_i32, %c0_i32_0 : i32, i32, i32
  }
}

</mosaic_0001>

<bundles_post_ra>
// kernel: iou_loss_pallas.1
= control target key start
LH: loop header
LB: loop body
LE: loop exit
PB: predicated region body
PF: predicated region fallthrough
CT: control target
= control target key end

     0   :  { %s95_s0 = inlined_call_operand.vmem [shape: f32[8,8,128], index: 0, kind: input, shape index: {}]   ;;  %s96_s1 = inlined_call_operand.vmem [shape: f32[1,8,128], index: 1, kind: output, shape index: {}]  }
   0x1   :  { %v8_v0 = vld [vmem:[%s95_s0] sm:$0xff]  ;;  %v49_v1 = vld [vmem:[%s95_s0 + $0x8] sm:$0xff]  ;;  %v50_v2 = vld [vmem:[%s95_s0 + $0x10] sm:$0xff] }
   0x2   :  { %v51_v3 = vld [vmem:[%s95_s0 + $0x18] sm:$0xff]  ;;  %v52_v4 = vld [vmem:[%s95_s0 + $0x20] sm:$0xff]  ;;  %v53_v5 = vld [vmem:[%s95_s0 + $0x28] sm:$0xff]  ;;  %v32_v6 = vsub.f32 %v50_v2, %v8_v0 }
   0x3   :  { %v54_v7 = vld [vmem:[%s95_s0 + $0x30] sm:$0xff]  ;;  %v55_v8 = vld [vmem:[%s95_s0 + $0x38] sm:$0xff]  ;;  %v24_v9 = vmax.f32 %v8_v0, %v52_v4  ;;  %v28_v10 = vmax.f32 %v49_v1, %v53_v5  ;;  %v33_v11 = vsub.f32 %v51_v3, %v49_v1 }
   0x4   :  { %v23_v12 = vmin.f32 %v50_v2, %v54_v7  ;;  %v27_v13 = vmin.f32 %v51_v3, %v55_v8  ;;  %v35_v14 = vsub.f32 %v54_v7, %v52_v4  ;;  %v36_v15 = vsub.f32 %v55_v8, %v53_v5 }
   0x5   :  { %v34_v16 = vmul.f32 %v33_v11, %v32_v6 }
   0x6   :  { %v25_v17 = vsub.f32 %v23_v12, %v24_v9  ;;  %v29_v18 = vsub.f32 %v27_v13, %v28_v10  ;;  %v37_v19 = vmul.f32 %v36_v15, %v35_v14 }
   0x8   :  { %v26_v20 = vmax.f32 %v25_v17, 0.0  ;;  %v30_v21 = vmax.f32 %v29_v18, 0.0  ;;  %v38_v22 = vadd.f32 %v37_v19, %v34_v16 }
   0xa   :  { %v31_v23 = vmul.f32 %v30_v21, %v26_v20 }
   0xc   :  { %v39_v24 = vsub.f32 %v38_v22, %v31_v23 }
   0xe   :  { %56 = vrcp.f32 %v39_v24 }
  0x18   :  { %v57_v25 = vpop.eup %56 }
  0x19   :  { %v41_v26 = vmul.f32 %v57_v25, %v31_v23 }
  0x1b   :  { %v42_v27 = vsub.f32 1.0, %v41_v26 }
  0x1d   :  { %44 = vst [vmem:[%s96_s1] sm:$0xff] %v42_v27 }

</bundles_post_ra>
